<compile_context>
chip_gen: v5e
topology: v5e:2x2
jax: 0.10.0
libtpu: 0.0.40
codegen_flags: <defaults>
</compile_context>

<pallas_src>
import functools

import jax
import jax.numpy as jnp
import numpy as np
from jax import lax
from jax.experimental import pallas as pl
from jax.experimental.pallas import tpu as pltpu


def _round_up(x, m):
    return (x + m - 1) // m * m


def _vmem_limit_bytes(needed):
    """Generation-aware VMEM limit: generous headroom, capped at half capacity."""
    cap = 64 << 20                      # conservative default (v7x per-core VMEM)
    try:
        info = pltpu.get_tpu_info()
        cap = int(getattr(info, "vmem_capacity_bytes", cap))
    except Exception:
        pass
    return int(min(max(4 * int(needed) + (4 << 20), 32 << 20), cap // 2))


# -----------------------------------------------------------------------------
# Shared in-kernel helper: K-tap temporal conv on the resident VMEM block.
#   x_ref block: (1, R_in, x_cols) bf16      w_ref block: (K, C_in, C_out_pad) bf16
# Tap k reads rows [row_offs[k], row_offs[k]+n_rows) and columns
# [col_offs[k], col_offs[k]+c_in); all offsets are static Python ints.
# -----------------------------------------------------------------------------
def _conv_taps(x_ref, w_ref, row_offs, col_offs, n_rows, c_in):
    acc = None
    for k in range(len(row_offs)):
        xk = x_ref[0, pl.ds(row_offs[k], n_rows), pl.ds(col_offs[k], c_in)]
        part = jnp.dot(xk, w_ref[k], preferred_element_type=jnp.float32)
        acc = part if acc is None else acc + part
    return acc                                            # (n_rows, C_out_pad) f32


# ---------- Pass 1: per-batch-item channel sum / sum-of-squares --------------
def conv_stats_kernel(x_ref, w_ref, sum_ref, sumsq_ref, *,
                      row_offs, col_offs, n_rows, c_in):
    acc = _conv_taps(x_ref, w_ref, row_offs, col_offs, n_rows, c_in)
    sum_ref[...] = jnp.sum(acc, axis=0)[None, None, :]
    sumsq_ref[...] = jnp.sum(acc * acc, axis=0)[None, None, :]


# ---------- Pass 2: recompute conv, fused BN FMA, transposed store -----------
def conv_bn_kernel(x_ref, w_ref, scale_ref, shift_ref, o_ref, *,
                   row_offs, col_offs, n_rows, c_in):
    acc = _conv_taps(x_ref, w_ref, row_offs, col_offs, n_rows, c_in)
    y = acc * scale_ref[...] + shift_ref[...]             # (n_rows, C_out_pad) f32
    # XLU transpose rides a slot the mem-bound kernel isn't using; output slab
    # is (C_out_pad, rows) so the wrapper needs no NCHW transpose afterwards.
    o_ref[...] = jnp.transpose(y)[None].astype(o_ref.dtype)


def temporal_conv_bn(x_nchw, weight, bias, gamma, beta, *,
                     kernel_size, stride=1, dilation=1, eps=1e-5):
    """x_nchw: (N, C_in, T, V)  weight: (C_out, C_in, K, 1)  bias/gamma/beta: (C_out,)"""
    N, C_in, T, V = x_nchw.shape
    C_out = weight.shape[0]
    K = kernel_size
    pad = (K + (K - 1) * (dilation - 1) - 1) // 2
    T_out = (T + 2 * pad - dilation * (K - 1) - 1) // stride + 1
    R_out = T_out * V                                     # output rows per batch item
    C_out_pad = _round_up(C_out, 128)

    # ---- glue: channels-last + temporal zero pad (single copy of the input) ----
    # TODO(synk): keep the surrounding model channels-last to drop this transpose.
    x = jnp.transpose(x_nchw, (0, 2, 3, 1))               # (N, T, V, C_in)
    x = jnp.pad(x, ((0, 0), (pad, pad), (0, 0), (0, 0)))  # pad temporal axis
    T_pad = T + 2 * pad

    if stride == 1:
        # Taps are contiguous row windows of the flattened (T_pad*V, C_in) slab.
        x_rows = x.reshape(N, T_pad * V, C_in)
        row_offs = tuple(k * dilation * V for k in range(K))
        col_offs = (0,) * K
        x_cols = C_in
    else:
        # Strided temporal conv: small im2col fallback (taps live in columns).
        # TODO(synk): halo-tiled in-kernel path for stride > 1 as well.
        slabs = [x[:, k * dilation:k * dilation + (T_out - 1) * stride + 1:stride]
                 for k in range(K)]                        # each (N, T_out, V, C_in)
        x_rows = jnp.concatenate(slabs, axis=-1).reshape(N, R_out, K * C_in)
        row_offs = (0,) * K
        col_offs = tuple(k * C_in for k in range(K))
        x_cols = K * C_in
    x_rows = x_rows.astype(jnp.bfloat16)
    R_in = x_rows.shape[1]

    # Weights: (C_out, C_in, K, 1) -> (K, C_in, C_out_pad) bf16, contraction unpadded.
    w = jnp.transpose(weight[:, :, :, 0], (2, 1, 0))       # (K, C_in, C_out)
    w = jnp.pad(w, ((0, 0), (0, 0), (0, C_out_pad - C_out))).astype(jnp.bfloat16)

    x_spec = pl.BlockSpec((1, R_in, x_cols), lambda n: (n, 0, 0))
    w_spec = pl.BlockSpec((K, C_in, C_out_pad), lambda n: (0, 0, 0))
    statics = dict(row_offs=row_offs, col_offs=col_offs, n_rows=R_out, c_in=C_in)

    x_block_bytes = R_in * x_cols * 2
    w_bytes = K * C_in * C_out_pad * 2
    acc_bytes = R_out * C_out_pad * 4
    p1_need = 2 * x_block_bytes + 2 * w_bytes + 2 * acc_bytes

    # ---- Pass 1: statistics only (no conv intermediate written to HBM) ----
    ch_sum, ch_sumsq = pl.pallas_call(
        functools.partial(conv_stats_kernel, **statics),
        grid=(N,),
        in_specs=[x_spec, w_spec],
        out_specs=[pl.BlockSpec((1, 1, C_out_pad), lambda n: (n, 0, 0)),
                   pl.BlockSpec((1, 1, C_out_pad), lambda n: (n, 0, 0))],
        out_shape=[jax.ShapeDtypeStruct((N, 1, C_out_pad), jnp.float32),
                   jax.ShapeDtypeStruct((N, 1, C_out_pad), jnp.float32)],
        compiler_params=pltpu.CompilerParams(
            dimension_semantics=("parallel",),             # per-item partials -> megacore OK
            vmem_limit_bytes=_vmem_limit_bytes(p1_need)),
    )(x_rows, w)

    # ---- finalize global BN statistics (tiny per-channel math in JAX) ----
    bias_p = jnp.pad(bias.astype(jnp.float32), (0, C_out_pad - C_out))[None, :]
    gamma_p = jnp.pad(gamma.astype(jnp.float32), (0, C_out_pad - C_out))[None, :]
    beta_p = jnp.pad(beta.astype(jnp.float32), (0, C_out_pad - C_out))[None, :]

    inv_rows = jnp.float32(1.0 / (N * R_out))
    mean_c = jnp.sum(ch_sum, axis=0) * inv_rows            # mean of bias-free conv
    var_c = jnp.sum(ch_sumsq, axis=0) * inv_rows - mean_c * mean_c   # bias cancels
    inv_std = lax.rsqrt(var_c + jnp.float32(eps))
    scale = gamma_p * inv_std                              # (1, C_out_pad)
    shift = beta_p - mean_c * scale                        # bias folded analytically

    p2_need = 2 * x_block_bytes + 2 * w_bytes + 4 * acc_bytes

    # ---- Pass 2: recompute conv + fused BN, write final output only ----
    out3 = pl.pallas_call(
        functools.partial(conv_bn_kernel, **statics),
        grid=(N,),
        in_specs=[x_spec, w_spec,
                  pl.BlockSpec((1, C_out_pad), lambda n: (0, 0)),
                  pl.BlockSpec((1, C_out_pad), lambda n: (0, 0))],
        out_specs=pl.BlockSpec((1, C_out_pad, R_out), lambda n: (n, 0, 0)),
        out_shape=jax.ShapeDtypeStruct((N, C_out_pad, R_out), jnp.float32),
        compiler_params=pltpu.CompilerParams(
            dimension_semantics=("parallel",),
            vmem_limit_bytes=_vmem_limit_bytes(p2_need)),
    )(x_rows, w, scale, shift)

    # ---- glue: drop channel padding; the slab is already NCHW-ordered ----
    return out3[:, :C_out, :].reshape(N, C_out, T_out, V)


def reference(x, weight, bias, gamma, beta, *, kernel_size, stride=1,
              dilation=1, eps=1e-5, matmul_dtype=None):
    """Pure-JAX reference for Conv2d((K,1)) + training-mode BatchNorm2d.
    matmul_dtype=bfloat16 pre-rounds the conv operands the same way the
    kernel's bf16 MXU path does (accumulation stays f32)."""
    K = kernel_size
    pad = (K + (K - 1) * (dilation - 1) - 1) // 2
    if matmul_dtype is not None:
        x = x.astype(matmul_dtype).astype(jnp.float32)
        weight = weight.astype(matmul_dtype).astype(jnp.float32)
    y = lax.conv_general_dilated(
        x, weight, window_strides=(stride, 1),
        padding=((pad, pad), (0, 0)),
        rhs_dilation=(dilation, 1),
        dimension_numbers=("NCHW", "OIHW", "NCHW"))
    y = y + bias[None, :, None, None]
    mean = jnp.mean(y, axis=(0, 2, 3), keepdims=True)
    var = jnp.mean((y - mean) ** 2, axis=(0, 2, 3), keepdims=True)
    y = (y - mean) / jnp.sqrt(var + eps)
    return y * gamma[None, :, None, None] + beta[None, :, None, None]


if __name__ == "__main__":
    # Small shapes consistent with the module: x is NCHW (batch, in_ch, T, V).
    N, C_in, T, V = 2, 4, 16, 16
    C_out, K, stride, dilation = 8, 3, 1, 1

    key = jax.random.PRNGKey(0)
    kx, kw, kb = jax.random.split(key, 3)
    x = jax.random.normal(kx, (N, C_in, T, V), dtype=jnp.float32)

    # Deterministic parameter init mimicking nn.Conv2d defaults (uniform fan-in).
    fan_in = C_in * K * 1
    bound = 1.0 / np.sqrt(fan_in)
    weight = jax.random.uniform(kw, (C_out, C_in, K, 1), jnp.float32, -bound, bound)
    bias = jax.random.uniform(kb, (C_out,), jnp.float32, -bound, bound)
    gamma = jnp.ones((C_out,), jnp.float32)   # BatchNorm2d default weight
    beta = jnp.zeros((C_out,), jnp.float32)   # BatchNorm2d default bias

    out = temporal_conv_bn(x, weight, bias, gamma, beta,
                           kernel_size=K, stride=stride, dilation=dilation)
    out = jax.block_until_ready(out)
    out_np = np.asarray(out)

    # Tight check against a reference using the same bf16-rounded conv operands
    # (the only intended numerical difference of the kernel path).
    ref_bf16 = reference(x, weight, bias, gamma, beta, kernel_size=K,
                         stride=stride, dilation=dilation,
                         matmul_dtype=jnp.bfloat16)
    np.testing.assert_allclose(out_np, np.asarray(ref_bf16), rtol=2e-3, atol=2e-3)

    # Loose sanity check against the pure-f32 module semantics.
    ref_f32 = reference(x, weight, bias, gamma, beta, kernel_size=K,
                        stride=stride, dilation=dilation)
    np.testing.assert_allclose(out_np, np.asarray(ref_f32), rtol=1e-1, atol=1e-1)

    print("KERNEL_OK")
</pallas_src>

<mosaic_0001>
module attributes {stable_mosaic.version = 11 : i64} {
  func.func @conv_stats_kernel(%arg0: i32, %arg1: memref<1x288x4xbf16, #tpu.memory_space<vmem>>, %arg2: memref<3x4x128xbf16, #tpu.memory_space<vmem>>, %arg3: memref<1x1x128xf32, #tpu.memory_space<vmem>>, %arg4: memref<1x1x128xf32, #tpu.memory_space<vmem>>) attributes {dimension_semantics = [#tpu.dimension_semantics<parallel>], iteration_bounds = array<i64: 2>, scalar_prefetch = 0 : i64, scratch_operands = 0 : i64, tpu.core_type = #tpu.core_type<tc>, window_params = [{transform_indices = @transform_0, window_bounds = array<i64: 1, 288, 4>}, {pipeline_mode = #tpu.pipeline_mode<synchronous>, transform_indices = @transform_1, window_bounds = array<i64: 3, 4, 128>}, {transform_indices = @transform_2, window_bounds = array<i64: 1, 1, 128>}, {transform_indices = @transform_3, window_bounds = array<i64: 1, 1, 128>}]} {
    %c0 = arith.constant 0 : index
    %c0_0 = arith.constant 0 : index
    %c0_1 = arith.constant 0 : index
    %0 = vector.load %arg1[%c0, %c0_0, %c0_1] : memref<1x288x4xbf16, #tpu.memory_space<vmem>>, vector<1x256x4xbf16>
    %1 = vector.shape_cast %0 : vector<1x256x4xbf16> to vector<256x4xbf16>
    %c0_2 = arith.constant 0 : index
    %c0_3 = arith.constant 0 : index
    %c0_4 = arith.constant 0 : index
    %2 = vector.load %arg2[%c0_2, %c0_3, %c0_4] : memref<3x4x128xbf16, #tpu.memory_space<vmem>>, vector<1x4x128xbf16>
    %3 = vector.shape_cast %2 : vector<1x4x128xbf16> to vector<4x128xbf16>
    %cst = arith.constant dense<0.000000e+00> : vector<256x128xf32>
    %4 = tpu.matmul %1, %3, %cst {dimension_numbers = #tpu.dot_dimension_numbers<[1], [0], [0], [1], [0, 0, 1, 1], [], []>} : vector<256x4xbf16>, vector<4x128xbf16>, vector<256x128xf32> -> vector<256x128xf32>
    %c0_5 = arith.constant 0 : index
    %c16 = arith.constant 16 : index
    %c0_6 = arith.constant 0 : index
    %5 = vector.load %arg1[%c0_5, %c16, %c0_6] : memref<1x288x4xbf16, #tpu.memory_space<vmem>>, vector<1x256x4xbf16>
    %6 = vector.shape_cast %5 : vector<1x256x4xbf16> to vector<256x4xbf16>
    %c1 = arith.constant 1 : index
    %c0_7 = arith.constant 0 : index
    %c0_8 = arith.constant 0 : index
    %7 = vector.load %arg2[%c1, %c0_7, %c0_8] : memref<3x4x128xbf16, #tpu.memory_space<vmem>>, vector<1x4x128xbf16>
    %8 = vector.shape_cast %7 : vector<1x4x128xbf16> to vector<4x128xbf16>
    %cst_9 = arith.constant dense<0.000000e+00> : vector<256x128xf32>
    %9 = tpu.matmul %6, %8, %cst_9 {dimension_numbers = #tpu.dot_dimension_numbers<[1], [0], [0], [1], [0, 0, 1, 1], [], []>} : vector<256x4xbf16>, vector<4x128xbf16>, vector<256x128xf32> -> vector<256x128xf32>
    %10 = arith.addf %4, %9 : vector<256x128xf32>
    %c0_10 = arith.constant 0 : index
    %c32 = arith.constant 32 : index
    %c0_11 = arith.constant 0 : index
    %11 = vector.load %arg1[%c0_10, %c32, %c0_11] : memref<1x288x4xbf16, #tpu.memory_space<vmem>>, vector<1x256x4xbf16>
    %12 = vector.shape_cast %11 : vector<1x256x4xbf16> to vector<256x4xbf16>
    %c2 = arith.constant 2 : index
    %c0_12 = arith.constant 0 : index
    %c0_13 = arith.constant 0 : index
    %13 = vector.load %arg2[%c2, %c0_12, %c0_13] : memref<3x4x128xbf16, #tpu.memory_space<vmem>>, vector<1x4x128xbf16>
    %14 = vector.shape_cast %13 : vector<1x4x128xbf16> to vector<4x128xbf16>
    %cst_14 = arith.constant dense<0.000000e+00> : vector<256x128xf32>
    %15 = tpu.matmul %12, %14, %cst_14 {dimension_numbers = #tpu.dot_dimension_numbers<[1], [0], [0], [1], [0, 0, 1, 1], [], []>} : vector<256x4xbf16>, vector<4x128xbf16>, vector<256x128xf32> -> vector<256x128xf32>
    %16 = arith.addf %10, %15 : vector<256x128xf32>
    %cst_15 = arith.constant dense<0.000000e+00> : vector<128xf32>
    %17 = vector.multi_reduction <add>, %16, %cst_15 [0] : vector<256x128xf32> to vector<128xf32>
    %18 = vector.shape_cast %17 : vector<128xf32> to vector<1x1x128xf32>
    %c0_16 = arith.constant 0 : index
    %c0_17 = arith.constant 0 : index
    %c0_18 = arith.constant 0 : index
    %19 = vector.load %arg3[%c0_16, %c0_17, %c0_18] : memref<1x1x128xf32, #tpu.memory_space<vmem>>, vector<1x1x128xf32>
    tpu.vector_store %arg3[%c0_16, %c0_17, %c0_18], %18 {strides = array<i32>} : memref<1x1x128xf32, #tpu.memory_space<vmem>>, vector<1x1x128xf32>,
    %20 = arith.mulf %16, %16 : vector<256x128xf32>
    %cst_19 = arith.constant dense<0.000000e+00> : vector<128xf32>
    %21 = vector.multi_reduction <add>, %20, %cst_19 [0] : vector<256x128xf32> to vector<128xf32>
    %22 = vector.shape_cast %21 : vector<128xf32> to vector<1x1x128xf32>
    %c0_20 = arith.constant 0 : index
    %c0_21 = arith.constant 0 : index
    %c0_22 = arith.constant 0 : index
    %23 = vector.load %arg4[%c0_20, %c0_21, %c0_22] : memref<1x1x128xf32, #tpu.memory_space<vmem>>, vector<1x1x128xf32>
    tpu.vector_store %arg4[%c0_20, %c0_21, %c0_22], %22 {strides = array<i32>} : memref<1x1x128xf32, #tpu.memory_space<vmem>>, vector<1x1x128xf32>,
    return
  }
  func.func @transform_0(%arg0: i32) -> (i32, i32, i32) {
    %c0_i32 = arith.constant 0 : i32
    %c0_i32_0 = arith.constant 0 : i32
    %c0_i32_1 = arith.constant 0 : i32
    return %arg0, %c0_i32, %c0_i32_0 : i32, i32, i32
  }
  func.func @transform_1(%arg0: i32) -> (i32, i32, i32) {
    %c0_i32 = arith.constant 0 : i32
    %c0_i32_0 = arith.constant 0 : i32
    %c0_i32_1 = arith.constant 0 : i32
    %c0_i32_2 = arith.constant 0 : i32
    return %c0_i32, %c0_i32_0, %c0_i32_1 : i32, i32, i32
  }
  func.func @transform_2(%arg0: i32) -> (i32, i32, i32) {
    %c0_i32 = arith.constant 0 : i32
    %c0_i32_0 = arith.constant 0 : i32
    %c0_i32_1 = arith.constant 0 : i32
    return %arg0, %c0_i32, %c0_i32_0 : i32, i32, i32
  }
  func.func @transform_3(%arg0: i32) -> (i32, i32, i32) {
    %c0_i32 = arith.constant 0 : i32
    %c0_i32_0 = arith.constant 0 : i32
    %c0_i32_1 = arith.constant 0 : i32
    return %arg0, %c0_i32, %c0_i32_0 : i32, i32, i32
  }
}

</mosaic_0001>

<bundles_post_ra>
// kernel: tpu_custom_call.1
= control target key start
LH: loop header
LB: loop body
LE: loop exit
PB: predicated region body
PF: predicated region fallthrough
CT: control target
= control target key end

     0   :  { %9 = vsyncpa [#allocation3], 0  ;;  %s1713_s0 = inlined_call_operand.vmem [shape: bf16[2,288,4], index: 0, kind: input, shape index: {}]   ;;  %s1714_s1 = inlined_call_operand.vmem [shape: bf16[3,4,128], index: 1, kind: input, shape index: {}]   ;;  %s1715_s2 = inlined_call_operand.hbm [shape: f32[2,1,128], index: 2, kind: output, shape index: {0}]   ;;  %s1716_s3 = inlined_call_operand.hbm [shape: f32[2,1,128], index: 3, kind: output, shape index: {1}]  }
   0x1   :  { %11 = vsyncpa [#allocation3 + $0x1], 0 }
   0x2   :  { %12 = vsyncpa [#allocation5], 0 }
   0x3   :  { %14 = vsyncpa [#allocation5 + $0x1], 0  ;;  %s1431_s12 = smov 0   ;;  %s1433_s13 = smov 0  }
   0x4   :  { %s1435_s14 = smov 0   ;;  %s1437_s15 = smov 0  }
   0x5 LB: > { %s1452_s16 = sadd.s32 4294967295, %s1409_s15   ;;  %s1045_s17 = sadd.s32 4294967294, %s1409_s15   ;;  %s1409_s15 = sphi %s1437_s15, %s1722_s15   ;;  %s1405_s14 = sphi %s1435_s14, %s1721_s14   ;;  %s1401_s13 = sphi %s1433_s13, %s1720_s13   ;;  %s1397_s12 = sphi %s1431_s12, %s1719_s12  }
   0x6   : > { %s1456_s18 = sadd.s32 1, %s1409_s15   ;;  %s74_s19 = sadd.s32 1, %s1405_s14 }
   0x7   : > { %s71_s20 = ssub.s32 %s1409_s15, %s1456_s18  ;;  %p84_p0 = scmp.ne.s32.totalorder %s1405_s14, %s1401_s13 }
   0x8   : > { %p72_p1 = scmp.eq.s32.totalorder %s71_s20, 0  ;;  %p85_p2 = scmp.eq.s32.totalorder %s1452_s16, 1 }
   0x9   : > { %p90_p3 = scmp.ne.s32.totalorder %s1401_s13, %s1397_s12  ;;  %p91_p4 = scmp.eq.s32.totalorder %s1045_s17, 1 }
   0xa   : > { %s1467_s21 = scalar_select %p72_p1, %s1405_s14, %s74_s19  }
   0xb   : > { %p1469_p5 = por %p85_p2, %p84_p0  ;;  %p1473_p6 = por %p91_p4, %p90_p3 }
   0xc   : > { %p1048_p7 = scmp.ge.s32.totalorder %s1409_s15, 1  ;;  %p146_p8 = scmp.lt.s32.totalorder %s1409_s15, 3 }
   0xe   : > { %p147_p9 = pnand %p1048_p7, %p146_p8 }
   0xf   : > { %p173_p10 = scmp.lt.s32.totalorder (!%p147_p9), %s1452_s16, 1  ;;  %s1644_s8 = sand.u32 (!%p147_p9), 1, %s1401_s13  }
  0x10   : > { %150 = sbr.rel (%p147_p9) target bundleno = 392 (0x188), region = 28  ;;  %s945_s11 = scalar_lea.hbm (!%p147_p9), %s1715_s2, %s1452_s16 }
  0x11   : > { %s958_s20 = scalar_lea.hbm (!%p147_p9), %s1716_s3, %s1452_s16  ;;  %s166_s24 = scalar_lea.vmem (!%p147_p9), [#allocation2], %s1644_s8 }
  0x12   : > { %s1655_s25 = sshll.u32 (!%p147_p9), %s166_s24, 4  ;;  %s1657_s26 = sshll.u32 (!%p147_p9), %s945_s11, 4  ;;  %s948_s25 = int_to_ptr.vmem [resolvable:$true] %s1655_s25  ;;  %s950_s26 = int_to_ptr.hbm [resolvable:$true] %s1657_s26 }
  0x13   : > { %s172_s27 = scalar_lea.vmem (!%p147_p9), [#allocation4], %s1644_s8  ;;  %s1662_s29 = sshll.u32 (!%p147_p9), %s958_s20, 4  ;;  %s963_s29 = int_to_ptr.hbm [resolvable:$true] %s1662_s29 }
  0x14   : > { %s1660_s28 = sshll.u32 (!%p147_p9), %s172_s27, 4  ;;  %s961_s28 = int_to_ptr.vmem [resolvable:$true] %s1660_s28 }
  0x15   : > { %v1050_v0 = vld [vmem:[%s1714_s1 + $0x2] sm:$0x3]  ;;  %vm345_vm0 = vcmask 1041408   ;;  %v211_v1 = vld [vmem:[%s1714_s1] sm:$0x3]  ;;  %s174_s30 = scalar_select %p173_p10, %s1452_s16, 1 }
  0x16   : > { %v347_v2 = vsel %vm345_vm0, %v1050_v0, 0  ;;  %v447_v3 = vsel %vm345_vm0, %v211_v1, 0  ;;  %v1151_v4 = vld [vmem:[%s1714_s1 + $0x4] sm:$0x3]  ;;  %vm296_vm1 = vcmask 31744   ;;  %s933_s16 = scalar_lea.sflag [#allocation3], %s1644_s8 }
  0x17   : > { %356 = vmatpush.bf16.msra.mxu0 %v347_v2  ;;  %1267 = vmatpush.bf16.msra.mxu3 %v347_v2  ;;  %v701_v5 = vsel %vm345_vm0, %v1151_v4, 0  ;;  %s1270_s4 = smul.u32 144, %s174_s30  ;;  %s1329_s30 = sshra.s32 %s950_s26, 4  ;;  %s1330_s30 = int_to_ptr.hbm [resolvable:$true] %s1329_s30 }
  0x18   : > { %456 = vmatpush.bf16.msra.mxu1 %v447_v3  ;;  %710 = vmatpush.bf16.msra.mxu2 %v701_v5  ;;  %p1336_p0 = scmp.lt.s32.totalorder %s1330_s30, %s1715_s2 }
  0x19   : > { %s1493_s7 = scalar_lea.vmem %s1713_s0, %s1270_s4  ;;  %s1331_s4 = scalar_lea.hbm %s1330_s30, 1 }
  0x1a   : > { %v1235_v6 = vld [vmem:[%s1493_s7 + $0x8] sm:$0xff]  ;;  %v1234_v8 = vld [vmem:[%s1493_s7] sm:$0xff]  ;;  %v1251_v9 = vld [vmem:[%s1493_s7 + $0x10] sm:$0xff]  ;;  %p1332_p11 = scmp.ne.s32.totalorder %s1330_s30, %s1331_s4 }
  0x1b   : > { %1268 = vmatpush.bf16.msrb.mxu3 %v447_v3  ;;  %v1247_v7 = vld [vmem:[%s1493_s7 + $0x68] sm:$0xff]  ;;  %1115 = vmatmul.msk.bf16.vlgmr.msra.gmra.mxu0 %vm296_vm1, %v1235_v6  ;;  %v1236_v10 = vld [vmem:[%s1493_s7 + $0x10] sm:$0xff]  ;;  %v1252_v12 = vld [vmem:[%s1493_s7 + $0x18] sm:$0xff] }
  0x1c   : > { %1127 = vmatmul.msk.bf16.vlgmr.msra.gmra.mxu3 %vm296_vm1, %v1247_v7  ;;  %1135 = vmatmul.msk.bf16.vlgmr.msra.gmra.mxu1 %vm296_vm1, %v1234_v8  ;;  %v1248_v11 = vld [vmem:[%s1493_s7 + $0x70] sm:$0xff]  ;;  %v1237_v13 = vld [vmem:[%s1493_s7 + $0x18] sm:$0xff]  ;;  %v1253_v15 = vld [vmem:[%s1493_s7 + $0x20] sm:$0xff]  ;;  %p1333_p12 = pnand %p1332_p11, %p1469_p5 }
  0x1d   : > { %1216 = vmatmul.msk.bf16.vlgmr.msra.gmra.mxu2 %vm296_vm1, %v1251_v9  ;;  %v1249_v14 = vld [vmem:[%s1493_s7 + $0x78] sm:$0xff]  ;;  %v1238_v16 = vld [vmem:[%s1493_s7 + $0x20] sm:$0xff]  ;;  %v1254_v18 = vld [vmem:[%s1493_s7 + $0x28] sm:$0xff] }
  0x1e   : > { %v1250_v17 = vld [vmem:[%s1493_s7 + $0x80] sm:$0xff]  ;;  %v1239_v19 = vld [vmem:[%s1493_s7 + $0x28] sm:$0xff]  ;;  %v1255_v21 = vld [vmem:[%s1493_s7 + $0x30] sm:$0xff]  ;;  %p1334_p13 = pneg %p1333_p12 }
  0x1f   : > { %1269 = vmatpush.bf16.msra.mxu3 %v701_v5  ;;  %v1526_v20 = vld [vmem:[%s1493_s7 + $0x60] sm:$0xff]  ;;  %v1240_v22 = vld [vmem:[%s1493_s7 + $0x30] sm:$0xff]  ;;  %v1256_v23 = vld [vmem:[%s1493_s7 + $0x38] sm:$0xff] }
  0x20   : > { %v1241_v24 = vld [vmem:[%s1493_s7 + $0x38] sm:$0xff]  ;;  %v1257_v25 = vld [vmem:[%s1493_s7 + $0x40] sm:$0xff]  ;;  %v1258_v27 = vld [vmem:[%s1493_s7 + $0x48] sm:$0xff] }
  0x21   : > { %v1242_v26 = vld [vmem:[%s1493_s7 + $0x40] sm:$0xff]  ;;  %v1243_v28 = vld [vmem:[%s1493_s7 + $0x48] sm:$0xff]  ;;  %v1263_v29 = vld [vmem:[%s1493_s7 + $0x70] sm:$0xff] }
  0x22   : > { %v1259_v31 = vld [vmem:[%s1493_s7 + $0x50] sm:$0xff]  ;;  %v1264_v43 = vld [vmem:[%s1493_s7 + $0x78] sm:$0xff]  ;;  %v1265_v1 = vld [vmem:[%s1493_s7 + $0x80] sm:$0xff] }
  0x23   : > { %v1244_v42 = vld [vmem:[%s1493_s7 + $0x50] sm:$0xff]  ;;  %v1260_v46 = vld [vmem:[%s1493_s7 + $0x58] sm:$0xff]  ;;  %v1261_v4 = vld [vmem:[%s1493_s7 + $0x60] sm:$0xff] }
  0x24   : > { %v1245_v0 = vld [vmem:[%s1493_s7 + $0x58] sm:$0xff] }
  0x2b   : > { %1116 = vmatmul.msk.bf16.gmra.mxu0 %vm296_vm1, %v1236_v10 }
  0x2c   : > { %1128 = vmatmul.msk.bf16.gmra.mxu3 %vm296_vm1, %v1248_v11  ;;  %1136 = vmatmul.msk.bf16.gmra.mxu1 %vm296_vm1, %v1235_v6 }
  0x2d   : > { %1217 = vmatmul.msk.bf16.gmra.mxu2 %vm296_vm1, %v1252_v12 }
  0x3b   : > { %1117 = vmatmul.msk.bf16.gmra.mxu0 %vm296_vm1, %v1237_v13 }
  0x3c   : > { %1129 = vmatmul.msk.bf16.gmra.mxu3 %vm296_vm1, %v1249_v14  ;;  %1137 = vmatmul.msk.bf16.gmra.mxu1 %vm296_vm1, %v1236_v10 }
  0x3d   : > { %1218 = vmatmul.msk.bf16.gmra.mxu2 %vm296_vm1, %v1253_v15 }
  0x4b   : > { %1118 = vmatmul.msk.bf16.gmra.mxu0 %vm296_vm1, %v1238_v16 }
  0x4c   : > { %1130 = vmatmul.msk.bf16.gmra.mxu3 %vm296_vm1, %v1250_v17  ;;  %1138 = vmatmul.msk.bf16.gmra.mxu1 %vm296_vm1, %v1237_v13 }
  0x4d   : > { %1219 = vmatmul.msk.bf16.gmra.mxu2 %vm296_vm1, %v1254_v18 }
  0x5b   : > { %1119 = vmatmul.msk.bf16.gmra.mxu0 %vm296_vm1, %v1239_v19 }
  0x5c   : > { %1147 = vmatmul.msk.bf16.vlgmr.msrb.gmra.mxu3 %vm296_vm1, %v1526_v20  ;;  %1139 = vmatmul.msk.bf16.gmra.mxu1 %vm296_vm1, %v1238_v16 }
  0x5d   : > { %1220 = vmatmul.msk.bf16.gmra.mxu2 %vm296_vm1, %v1255_v21 }
  0x6b   : > { %1120 = vmatmul.msk.bf16.gmra.mxu0 %vm296_vm1, %v1240_v22 }
  0x6c   : > { %1148 = vmatmul.msk.bf16.gmra.mxu3 %vm296_vm1, %v1247_v7  ;;  %1140 = vmatmul.msk.bf16.gmra.mxu1 %vm296_vm1, %v1239_v19 }
  0x6d   : > { %1221 = vmatmul.msk.bf16.gmra.mxu2 %vm296_vm1, %v1256_v23 }
  0x7b   : > { %1121 = vmatmul.msk.bf16.gmra.mxu0 %vm296_vm1, %v1241_v24 }
  0x7c   : > { %1149 = vmatmul.msk.bf16.gmra.mxu3 %vm296_vm1, %v1248_v11  ;;  %1141 = vmatmul.msk.bf16.gmra.mxu1 %vm296_vm1, %v1240_v22  ;;  %v1266_v22 = vld [vmem:[%s1493_s7 + $0x88] sm:$0xff] }
  0x7d   : > { %1222 = vmatmul.msk.bf16.gmra.mxu2 %vm296_vm1, %v1257_v25  ;;  %v1262_v25 = vld [vmem:[%s1493_s7 + $0x68] sm:$0xff]  ;;  %s1335_s7 = scalar_lea.hbm %s1715_s2, 2 }
  0x7e   : > { %p1337_p1 = scmp.lt.s32.totalorder %s1335_s7, %s1331_s4 }
  0x80   : > { %p1338_p2 = por %p1337_p1, %p1336_p0 }
  0x82   : > { %p1339_p3 = pnand %p1338_p2, %p1334_p13 }
  0x8b   : > { %1122 = vmatmul.msk.bf16.gmra.mxu0 %vm296_vm1, %v1242_v26 }
  0x8c   : > { %1150 = vmatmul.msk.bf16.gmra.mxu3 %vm296_vm1, %v1249_v14  ;;  %1142 = vmatmul.msk.bf16.gmra.mxu1 %vm296_vm1, %v1241_v24 }
  0x8d   : > { %1223 = vmatmul.msk.bf16.gmra.mxu2 %vm296_vm1, %v1258_v27 }
  0x98   : > { %v358_v30 = vpop.f32.mrf.mxu0 }
  0x99   : > { %v458_v32 = vpop.f32.mrf.mxu1 }
  0x9a   : > { %v459_v33 = vadd.f32 %v458_v32, %v358_v30 }
  0x9b   : > { %1123 = vmatmul.msk.bf16.gmra.mxu0 %vm296_vm1, %v1243_v28 }
  0x9c   : > { %1228 = vmatmul.msk.bf16.vlgmr.msra.gmra.mxu3 %vm296_vm1, %v1263_v29  ;;  %1143 = vmatmul.msk.bf16.gmra.mxu1 %vm296_vm1, %v1242_v26 }
  0x9d   : > { %1224 = vmatmul.msk.bf16.gmra.mxu2 %vm296_vm1, %v1259_v31 }
  0x9f   : > { %v1559_v34 = vpop.f32.mrf.mxu3 }
  0xa0   : > { %v712_v35 = vpop.f32.mrf.mxu2  ;;  %v360_v37 = vpop.f32.mrf.mxu0 }
  0xa1   : > { %v792_v36 = vadd.f32 %v712_v35, %v459_v33  ;;  %v460_v38 = vpop.f32.mrf.mxu1 }
  0xa2   : > { %v461_v39 = vadd.f32 %v460_v38, %v360_v37 }
  0xa3   : > { %v862_v48 = vmul.f32 %v792_v36, %v792_v36 }
  0xa7   : > { %v1561_v40 = vpop.f32.mrf.mxu3 }
  0xa8   : > { %v714_v41 = vpop.f32.mrf.mxu2  ;;  %v363_v45 = vpop.f32.mrf.mxu0 }
  0xa9   : > { %v793_v44 = vadd.f32 %v714_v41, %v461_v39  ;;  %v463_v47 = vpop.f32.mrf.mxu1 }
  0xaa   : > { %v464_v51 = vadd.f32 %v463_v47, %v363_v45 }
  0xab   : > { %v824_v49 = vadd.f32 %v793_v44, %v792_v36  ;;  %v863_v50 = vmul.f32 %v793_v44, %v793_v44  ;;  %1124 = vmatmul.msk.bf16.gmra.mxu0 %vm296_vm1, %v1244_v42 }
  0xac   : > { %1229 = vmatmul.msk.bf16.gmra.mxu3 %vm296_vm1, %v1264_v43  ;;  %1144 = vmatmul.msk.bf16.gmra.mxu1 %vm296_vm1, %v1243_v28 }
  0xad   : > { %v894_v52 = vadd.f32 %v863_v50, %v862_v48  ;;  %1225 = vmatmul.msk.bf16.gmra.mxu2 %vm296_vm1, %v1260_v46 }
  0xaf   : > { %v1570_v53 = vpop.f32.mrf.mxu3 }
  0xb0   : > { %v717_v54 = vpop.f32.mrf.mxu2  ;;  %v365_v56 = vpop.f32.mrf.mxu0 }
  0xb1   : > { %v794_v55 = vadd.f32 %v717_v54, %v464_v51  ;;  %v465_v57 = vpop.f32.mrf.mxu1 }
  0xb2   : > { %v466_v60 = vadd.f32 %v465_v57, %v365_v56 }
  0xb3   : > { %v825_v58 = vadd.f32 %v824_v49, %v794_v55  ;;  %v864_v59 = vmul.f32 %v794_v55, %v794_v55 }
  0xb5   : > { %v895_v61 = vadd.f32 %v894_v52, %v864_v59 }
  0xb7   : > { %v1572_v62 = vpop.f32.mrf.mxu3 }
  0xb8   : > { %v719_v63 = vpop.f32.mrf.mxu2  ;;  %v368_v3 = vpop.f32.mrf.mxu0 }
  0xb9   : > { %v795_v2 = vadd.f32 %v719_v63, %v466_v60  ;;  %v468_v5 = vpop.f32.mrf.mxu1 }
  0xba   : > { %v469_v8 = vadd.f32 %v468_v5, %v368_v3 }
  0xbb   : > { %v826_v6 = vadd.f32 %v825_v58, %v795_v2  ;;  %v865_v7 = vmul.f32 %v795_v2, %v795_v2  ;;  %1125 = vmatmul.msk.bf16.gmra.mxu0 %vm296_vm1, %v1245_v0 }
  0xbc   : > { %1230 = vmatmul.msk.bf16.gmra.mxu3 %vm296_vm1, %v1265_v1  ;;  %1145 = vmatmul.msk.bf16.gmra.mxu1 %vm296_vm1, %v1244_v42 }
  0xbd   : > { %v896_v9 = vadd.f32 %v895_v61, %v865_v7  ;;  %1226 = vmatmul.msk.bf16.gmra.mxu2 %vm296_vm1, %v1261_v4 }
  0xbf   : > { %v1581_v10 = vpop.f32.mrf.mxu3 }
  0xc0   : > { %v722_v11 = vpop.f32.mrf.mxu2  ;;  %v370_v13 = vpop.f32.mrf.mxu0 }
  0xc1   : > { %v796_v12 = vadd.f32 %v722_v11, %v469_v8  ;;  %v470_v14 = vpop.f32.mrf.mxu1 }
  0xc2   : > { %v471_v17 = vadd.f32 %v470_v14, %v370_v13 }
  0xc3   : > { %v827_v15 = vadd.f32 %v826_v6, %v796_v12  ;;  %v866_v16 = vmul.f32 %v796_v12, %v796_v12 }
  0xc5   : > { %v897_v18 = vadd.f32 %v896_v9, %v866_v16 }
  0xc7   : > { %v1583_v19 = vpop.f32.mrf.mxu3 }
  0xc8   : > { %v724_v21 = vpop.f32.mrf.mxu2  ;;  %v373_v24 = vpop.f32.mrf.mxu0 }
  0xc9   : > { %v797_v23 = vadd.f32 %v724_v21, %v471_v17  ;;  %v473_v26 = vpop.f32.mrf.mxu1 }
  0xca   : > { %v474_v29 = vadd.f32 %v473_v26, %v373_v24 }
  0xcb   : > { %v828_v27 = vadd.f32 %v827_v15, %v797_v23  ;;  %v867_v28 = vmul.f32 %v797_v23, %v797_v23  ;;  %1126 = vmatmul.msk.bf16.gmra.mxu0 %vm296_vm1, %v1526_v20 }
  0xcc   : > { %1231 = vmatmul.msk.bf16.gmra.mxu3 %vm296_vm1, %v1266_v22  ;;  %1146 = vmatmul.msk.bf16.gmra.mxu1 %vm296_vm1, %v1245_v0 }
  0xcd   : > { %v898_v30 = vadd.f32 %v897_v18, %v867_v28  ;;  %1227 = vmatmul.msk.bf16.gmra.mxu2 %vm296_vm1, %v1262_v25 }
  0xcf   : > { %v1592_v31 = vpop.f32.mrf.mxu3 }
  0xd0   : > { %v727_v32 = vpop.f32.mrf.mxu2  ;;  %v375_v35 = vpop.f32.mrf.mxu0 }
  0xd1   : > { %v798_v33 = vadd.f32 %v727_v32, %v474_v29  ;;  %v475_v36 = vpop.f32.mrf.mxu1 }
  0xd2   : > { %v476_v39 = vadd.f32 %v475_v36, %v375_v35 }
  0xd3   : > { %v829_v37 = vadd.f32 %v828_v27, %v798_v33  ;;  %v868_v38 = vmul.f32 %v798_v33, %v798_v33 }
  0xd5   : > { %v899_v41 = vadd.f32 %v898_v30, %v868_v38 }
  0xd7   : > { %v1594_v42 = vpop.f32.mrf.mxu3 }
  0xd8   : > { %v729_v20 = vpop.f32.mrf.mxu2  ;;  %v378_v44 = vpop.f32.mrf.mxu0 }
  0xd9   : > { %v799_v43 = vadd.f32 %v729_v20, %v476_v39  ;;  %v478_v45 = vpop.f32.mrf.mxu1 }
  0xda   : > { %v479_v48 = vadd.f32 %v478_v45, %v378_v44 }
  0xdb   : > { %v830_v46 = vadd.f32 %v829_v37, %v799_v43  ;;  %v869_v47 = vmul.f32 %v799_v43, %v799_v43 }
  0xdd   : > { %v900_v49 = vadd.f32 %v899_v41, %v869_v47 }
  0xdf   : > { %v518_v50 = vpop.f32.mrf.mxu3 }
  0xe0   : > { %v1597_v51 = vadd.f32 %v518_v50, %v1559_v34  ;;  %v732_v52 = vpop.f32.mrf.mxu2  ;;  %v380_v55 = vpop.f32.mrf.mxu0 }
  0xe1   : > { %v800_v54 = vadd.f32 %v732_v52, %v479_v48  ;;  %v480_v56 = vpop.f32.mrf.mxu1 }
  0xe2   : > { %v481_v59 = vadd.f32 %v480_v56, %v380_v55 }
  0xe3   : > { %v831_v57 = vadd.f32 %v830_v46, %v800_v54  ;;  %v870_v58 = vmul.f32 %v800_v54, %v800_v54 }
  0xe5   : > { %v901_v60 = vadd.f32 %v900_v49, %v870_v58 }
  0xe7   : > { %v520_v61 = vpop.f32.mrf.mxu3 }
  0xe8   : > { %v1600_v63 = vadd.f32 %v520_v61, %v1561_v40  ;;  %v734_v0 = vpop.f32.mrf.mxu2  ;;  %v383_v2 = vpop.f32.mrf.mxu0 }
  0xe9   : > { %v801_v1 = vadd.f32 %v734_v0, %v481_v59  ;;  %v483_v3 = vpop.f32.mrf.mxu1 }
  0xea   : > { %v484_v34 = vadd.f32 %v483_v3, %v383_v2 }
  0xeb   : > { %v832_v4 = vadd.f32 %v831_v57, %v801_v1  ;;  %v871_v5 = vmul.f32 %v801_v1, %v801_v1 }
  0xed   : > { %v902_v6 = vadd.f32 %v901_v60, %v871_v5 }
  0xef   : > { %v523_v7 = vpop.f32.mrf.mxu3 }
  0xf0   : > { %v1603_v8 = vadd.f32 %v523_v7, %v1570_v53  ;;  %v737_v9 = vpop.f32.mrf.mxu2  ;;  %v385_v12 = vpop.f32.mrf.mxu0 }
  0xf1   : > { %v802_v11 = vadd.f32 %v737_v9, %v484_v34  ;;  %v485_v13 = vpop.f32.mrf.mxu1 }
  0xf2   : > { %v486_v40 = vadd.f32 %v485_v13, %v385_v12 }
  0xf3   : > { %v833_v14 = vadd.f32 %v832_v4, %v802_v11  ;;  %v872_v15 = vmul.f32 %v802_v11, %v802_v11 }
  0xf5   : > { %v903_v16 = vadd.f32 %v902_v6, %v872_v15 }
  0xf7   : > { %v525_v17 = vpop.f32.mrf.mxu3 }
  0xf8   : > { %v1606_v18 = vadd.f32 %v525_v17, %v1572_v62  ;;  %v739_v21 = vpop.f32.mrf.mxu2  ;;  %v388_v23 = vpop.f32.mrf.mxu0 }
  0xf9   : > { %v803_v22 = vadd.f32 %v739_v21, %v486_v40  ;;  %v488_v24 = vpop.f32.mrf.mxu1 }
  0xfa   : > { %v489_v53 = vadd.f32 %v488_v24, %v388_v23 }
  0xfb   : > { %v834_v25 = vadd.f32 %v833_v14, %v803_v22  ;;  %v873_v26 = vmul.f32 %v803_v22, %v803_v22 }
  0xfd   : > { %v904_v27 = vadd.f32 %v903_v16, %v873_v26 }
  0xff   : > { %v528_v28 = vpop.f32.mrf.mxu3 }
 0x100   : > { %v1609_v29 = vadd.f32 %v528_v28, %v1581_v10  ;;  %v742_v30 = vpop.f32.mrf.mxu2  ;;  %v390_v33 = vpop.f32.mrf.mxu0 }
 0x101   : > { %v804_v32 = vadd.f32 %v742_v30, %v489_v53  ;;  %v490_v35 = vpop.f32.mrf.mxu1 }
 0x102   : > { %v491_v34 = vadd.f32 %v490_v35, %v390_v33 }
 0x103   : > { %v835_v36 = vadd.f32 %v834_v25, %v804_v32  ;;  %v874_v37 = vmul.f32 %v804_v32, %v804_v32 }
 0x105   : > { %v905_v62 = vadd.f32 %v904_v27, %v874_v37 }
 0x107   : > { %v530_v38 = vpop.f32.mrf.mxu3 }
 0x108   : > { %v1612_v39 = vadd.f32 %v530_v38, %v1583_v19  ;;  %v744_v41 = vpop.f32.mrf.mxu2  ;;  %v393_v20 = vpop.f32.mrf.mxu0 }
 0x109   : > { %v493_v43 = vpop.f32.mrf.mxu1  ;;  %v805_v7 = vadd.f32 %v744_v41, %v491_v34 }
 0x10a   : > { %v494_v6 = vadd.f32 %v493_v43, %v393_v20 }
 0x10b   : > { %v875_v40 = vmul.f32 %v805_v7, %v805_v7  ;;  %v836_v17 = vadd.f32 %v835_v36, %v805_v7 }
 0x10d   : > { %v906_v26 = vadd.f32 %v905_v62, %v875_v40 }
 0x10f   : > { %v533_v44 = vpop.f32.mrf.mxu3 }
 0x110   : > { %v1615_v45 = vadd.f32 %v533_v44, %v1592_v31  ;;  %v747_v10 = vpop.f32.mrf.mxu2  ;;  %v395_v46 = vpop.f32.mrf.mxu0 }
 0x111   : > { %v495_v47 = vpop.f32.mrf.mxu1  ;;  %v806_v12 = vadd.f32 %v747_v10, %v494_v6 }
 0x112   : > { %v496_v13 = vadd.f32 %v495_v47, %v395_v46 }
 0x113   : > { %v876_v21 = vmul.f32 %v806_v12, %v806_v12  ;;  %v837_v53 = vadd.f32 %v836_v17, %v806_v12 }
 0x115   : > { %v907_v32 = vadd.f32 %v906_v26, %v876_v21 }
 0x117   : > { %v1617_v48 = vpop.f32.mrf.mxu3 }
 0x118   : > { %v749_v49 = vpop.f32.mrf.mxu2  ;;  %v398_v50 = vpop.f32.mrf.mxu0 }
 0x119   : > { %v498_v52 = vpop.f32.mrf.mxu1  ;;  %v807_v16 = vadd.f32 %v749_v49, %v496_v13 }
 0x11a   : > { %v499_v14 = vadd.f32 %v498_v52, %v398_v50 }
 0x11b   : > { %v877_v27 = vmul.f32 %v807_v16, %v807_v16  ;;  %v838_v33 = vadd.f32 %v837_v53, %v807_v16 }
 0x11d   : > { %v908_v36 = vadd.f32 %v907_v32, %v877_v27 }
 0x11f   : > { %v1619_v54 = vpop.f32.mrf.mxu3 }
 0x120   : > { %v752_v55 = vpop.f32.mrf.mxu2  ;;  %v400_v19 = vpop.f32.mrf.mxu0  ;;  %v816_v40 = vadd.f32 %v1619_v54, %v1597_v51 }
 0x121   : > { %v500_v56 = vpop.f32.mrf.mxu1  ;;  %v808_v22 = vadd.f32 %v752_v55, %v499_v14 }
 0x122   : > { %v501_v24 = vadd.f32 %v500_v56, %v400_v19  ;;  %v886_v27 = vmul.f32 %v816_v40, %v816_v40 }
 0x123   : > { %v878_v35 = vmul.f32 %v808_v22, %v808_v22  ;;  %v839_v44 = vadd.f32 %v838_v33, %v808_v22 }
 0x125   : > { %v909_v47 = vadd.f32 %v908_v36, %v878_v35 }
 0x127   : > { %v1621_v58 = vpop.f32.mrf.mxu3 }
 0x128   : > { %v754_v57 = vpop.f32.mrf.mxu2  ;;  %v403_v59 = vpop.f32.mrf.mxu0 }
 0x129   : > { %v503_v60 = vpop.f32.mrf.mxu1  ;;  %v809_v30 = vadd.f32 %v754_v57, %v501_v24  ;;  %v817_v24 = vadd.f32 %v1621_v58, %v1600_v63 }
 0x12a   : > { %v504_v25 = vadd.f32 %v503_v60, %v403_v59 }
 0x12b   : > { %v879_v10 = vmul.f32 %v809_v30, %v809_v30  ;;  %v840_v49 = vadd.f32 %v839_v44, %v809_v30  ;;  %v887_v33 = vmul.f32 %v817_v24, %v817_v24 }
 0x12d   : > { %v910_v57 = vadd.f32 %v909_v47, %v879_v10 }
 0x12f   : > { %v1623_v0 = vpop.f32.mrf.mxu3 }
 0x130   : > { %v757_v31 = vpop.f32.mrf.mxu2  ;;  %v405_v61 = vpop.f32.mrf.mxu0 }
 0x131   : > { %v505_v1 = vpop.f32.mrf.mxu1  ;;  %v810_v41 = vadd.f32 %v757_v31, %v504_v25 }
 0x132   : > { %v506_v20 = vadd.f32 %v505_v1, %v405_v61 }
 0x133   : > { %v880_v50 = vmul.f32 %v810_v41, %v810_v41  ;;  %v841_v59 = vadd.f32 %v840_v49, %v810_v41 }
 0x135   : > { %v911_v6 = vadd.f32 %v910_v57, %v880_v50 }
 0x137   : > { %v1625_v5 = vpop.f32.mrf.mxu3 }
 0x138   : > { %v759_v2 = vpop.f32.mrf.mxu2  ;;  %v408_v3 = vpop.f32.mrf.mxu0  ;;  %v819_v51 = vadd.f32 %v1625_v5, %v1606_v18 }
 0x139   : > { %v508_v4 = vpop.f32.mrf.mxu1  ;;  %v811_v46 = vadd.f32 %v759_v2, %v506_v20 }
 0x13a   : > { %v509_v43 = vadd.f32 %v508_v4, %v408_v3  ;;  %v889_v41 = vmul.f32 %v819_v51, %v819_v51 }
 0x13b   : > { %v881_v60 = vmul.f32 %v811_v46, %v811_v46  ;;  %v842_v31 = vadd.f32 %v841_v59, %v811_v46 }
 0x13d   : > { %v912_v7 = vadd.f32 %v911_v6, %v881_v60 }
 0x13f   : > { %v1627_v23 = vpop.f32.mrf.mxu3 }
 0x140   : > { %v762_v9 = vpop.f32.mrf.mxu2  ;;  %v410_v11 = vpop.f32.mrf.mxu0 }
 0x141   : > { %v510_v15 = vpop.f32.mrf.mxu1  ;;  %v812_v62 = vadd.f32 %v762_v9, %v509_v43 }
 0x142   : > { %v511_v52 = vadd.f32 %v510_v15, %v410_v11 }
 0x143   : > { %v882_v61 = vmul.f32 %v812_v62, %v812_v62  ;;  %v843_v2 = vadd.f32 %v842_v31, %v812_v62 }
 0x145   : > { %v913_v13 = vadd.f32 %v912_v7, %v882_v61 }
 0x147   : > { %v784_v19 = vpop.f32.mrf.mxu3 }
 0x148   : > { %v764_v28 = vpop.f32.mrf.mxu2  ;;  %v413_v37 = vpop.f32.mrf.mxu0  ;;  %v821_v20 = vadd.f32 %v784_v19, %v1612_v39 }
 0x149   : > { %v513_v38 = vpop.f32.mrf.mxu1  ;;  %v813_v34 = vadd.f32 %v764_v28, %v511_v52  ;;  %v818_v28 = vadd.f32 %v1623_v0, %v1603_v8  ;;  %v536_v8 = vadd.f32 %v1617_v48, %v1594_v42 }
 0x14a   : > { %v514_v55 = vadd.f32 %v513_v38, %v413_v37  ;;  %v820_v38 = vadd.f32 %v1627_v23, %v1609_v29  ;;  %v891_v46 = vmul.f32 %v821_v20, %v821_v20 }
 0x14b   : > { %v883_v12 = vmul.f32 %v813_v34, %v813_v34  ;;  %v844_v14 = vadd.f32 %v843_v2, %v813_v34  ;;  %v888_v37 = vmul.f32 %v818_v28, %v818_v28 }
 0x14c   : > { %v890_v44 = vmul.f32 %v820_v38, %v820_v38 }
 0x14d   : > { %v914_v16 = vadd.f32 %v913_v13, %v883_v12 }
 0x14f   : > { %v787_v22 = vpop.f32.mrf.mxu3 }
 0x150   : > { %v767_v56 = vpop.f32.mrf.mxu2  ;;  %v415_v3 = vpop.f32.mrf.mxu0  ;;  %v822_v18 = vadd.f32 %v787_v22, %v1615_v45 }
 0x151   : > { %v814_v1 = vadd.f32 %v767_v56, %v514_v55  ;;  %v515_v4 = vpop.f32.mrf.mxu1 }
 0x152   : > { %v516_v11 = vadd.f32 %v515_v4, %v415_v3  ;;  %v892_v49 = vmul.f32 %v822_v18, %v822_v18 }
 0x153   : > { %v884_v9 = vmul.f32 %v814_v1, %v814_v1  ;;  %v845_v17 = vadd.f32 %v844_v14, %v814_v1 }
 0x155   : > { %v915_v25 = vadd.f32 %v914_v16, %v884_v9 }
 0x157   : > { %v789_v0 = vpop.f32.mrf.mxu3 }
 0x158   : > { %v769_v15 = vpop.f32.mrf.mxu2  ;;  %v823_v47 = vadd.f32 %v789_v0, %v536_v8 }
 0x159   : > { %v815_v21 = vadd.f32 %v769_v15, %v516_v11 }
 0x15a   : > { %v893_v52 = vmul.f32 %v823_v47, %v823_v47 }
 0x15b   : > { %v846_v26 = vadd.f32 %v845_v17, %v815_v21  ;;  %v885_v53 = vmul.f32 %v815_v21, %v815_v21 }
 0x15d   : > { %v847_v30 = vadd.f32 %v846_v26, %v816_v40  ;;  %v916_v32 = vadd.f32 %v915_v25, %v885_v53 }
 0x15f   : > { %v848_v54 = vadd.f32 %v847_v30, %v817_v24  ;;  %v917_v35 = vadd.f32 %v916_v32, %v886_v27 }
 0x161   : > { %v849_v63 = vadd.f32 %v848_v54, %v818_v28  ;;  %v918_v58 = vadd.f32 %v917_v35, %v887_v33 }
 0x163   : > { %v919_v43 = vadd.f32 %v918_v58, %v888_v37  ;;  %v850_v36 = vadd.f32 %v849_v63, %v819_v51 }
 0x165   : > { %v851_v5 = vadd.f32 %v850_v36, %v820_v38  ;;  %v920_v10 = vadd.f32 %v919_v43, %v889_v41 }
 0x167   : > { %v852_v29 = vadd.f32 %v851_v5, %v821_v20  ;;  %v921_v23 = vadd.f32 %v920_v10, %v890_v44 }
 0x169   : > { %v853_v39 = vadd.f32 %v852_v29, %v822_v18  ;;  %v922_v50 = vadd.f32 %v921_v23, %v891_v46 }
 0x16b   : > { %v854_v62 = vadd.f32 %v853_v39, %v823_v47  ;;  %v923_v55 = vadd.f32 %v922_v50, %v892_v49 }
 0x16d   : > { %v855_v42 = vrot.slane %v854_v62, 4  ;;  %v924_v48 = vadd.f32 %v923_v55, %v893_v52 }
 0x16f   : > { %v856_v45 = vadd.f32 %v855_v42, %v854_v62  ;;  %v925_v19 = vrot.slane %v924_v48, 4 }
 0x171   : > { %v857_v56 = vrot.slane %v856_v45, 2  ;;  %v926_v57 = vadd.f32 %v925_v19, %v924_v48 }
 0x173   : > { %v858_v59 = vadd.f32 %v857_v56, %v856_v45  ;;  %v927_v60 = vrot.slane %v926_v57, 2 }
 0x175   : > { %v859_v34 = vrot.slane %v858_v59, 1  ;;  %v928_v6 = vadd.f32 %v927_v60, %v926_v57 }
 0x177   : > { %v860_v31 = vadd.f32 %v859_v34, %v858_v59  ;;  %v929_v61 = vrot.slane %v928_v6, 1 }
 0x179   : > { %861 = vst [vmem:[%s166_s24] sm:$0x1] %v860_v31  ;;  %v930_v1 = vadd.f32 %v929_v61, %v928_v6 }
 0x17a   : > { %1342 = shalt.err (!%p1339_p3)
}
 0x17b   : > { %1271 = dma.vmem_to_hbm [thread:$0]  (%p1469_p5), %s948_s25, 16, %s950_s26, %s933_s16   ;;  %931 = vst [vmem:[%s172_s27] sm:$0x1] %v930_v1 }
 0x17c   : > { %s937_s11 = scalar_lea.sflag [#allocation5], %s1644_s8  ;;  %s1357_s17 = sshra.s32 %s963_s29, 4  ;;  %s1358_s17 = int_to_ptr.hbm [resolvable:$true] %s1357_s17 }
 0x17d   : > { %s1359_s19 = scalar_lea.hbm %s1358_s17, 1  ;;  %s1363_s30 = scalar_lea.hbm %s1716_s3, 2 }
 0x17e   : > { %p1360_p4 = scmp.ne.s32.totalorder %s1358_s17, %s1359_s19  ;;  %p1364_p9 = scmp.lt.s32.totalorder %s1358_s17, %s1716_s3 }
 0x17f   : > { %p1365_p10 = scmp.lt.s32.totalorder %s1363_s30, %s1359_s19 }
 0x180   : > { %p1361_p7 = pnand %p1360_p4, %p1469_p5 }
 0x181   : > { %p1366_p11 = por %p1365_p10, %p1364_p9 }
 0x182   : > { %p1362_p8 = pneg %p1361_p7 }
 0x184   : > { %p1367_p12 = pnand %p1366_p11, %p1362_p8 }
 0x186   : > { %1370 = shalt.err (!%p1367_p12)
}
 0x187   : > { %1272 = dma.vmem_to_hbm [thread:$0]  (%p1469_p5), %s961_s28, 16, %s963_s29, %s937_s11  }
 0x188 PF: > { %p1282_p13 = scmp.ge.s32.totalorder %s1409_s15, 2  ;;  %s974_s8 = sand.u32 1, %s1397_s12  }
 0x189   : > { %s975_s25 = scalar_lea.sflag [#allocation3], %s974_s8 }
 0x18a   : > { %p1276_p0 = pnand %p1282_p13, %p1473_p6 }
 0x18c   : > { %p1277_p1 = pneg %p1276_p0 }
 0x18e   : > { %1388 = dma.done.wait (%p1277_p1), %s975_s25, 16  }
 0x18f   : > { %1390 = vsyncadd (%p1277_p1), %s975_s25, 4294967280  ;;  %s984_s26 = scalar_lea.sflag [#allocation5], %s974_s8 }
 0x190   : > { %1392 = dma.done.wait (%p1277_p1), %s984_s26, 16  }
 0x191   : > { %1394 = vsyncadd (%p1277_p1), %s984_s26, 4294967280  ;;  %p17_p5 = scmp.ge.s32.totalorder %s1456_s18, 4   ;;  %s1719_s12 = smov %s1401_s13 }
 0x192   : > { %s1720_s13 = smov %s1405_s14  ;;  %s1721_s14 = smov %s1467_s21 }
 0x193   : > { %s1722_s15 = smov %s1456_s18  ;;  %19 = sbr.rel (!%p17_p5) target bundleno = 5 (0x5), region = 82 }
 0x198   :  { %989 = vsyncpa [#allocation3], 1 }
 0x199   :  { %991 = vsyncpa [#allocation3 + $0x1], 1 }
 0x19a   :  { %992 = vsyncpa [#allocation5], 1 }
 0x19b   :  { %994 = vsyncpa [#allocation5 + $0x1], 1 }

</bundles_post_ra>
